<compile_context>
chip_gen: v7x
topology: tpu7x:2x2x1
jax: 0.10.0
libtpu: 0.0.40
codegen_flags: <defaults>
</compile_context>

<pallas_src>
import functools

import jax
import jax.numpy as jnp
from jax.experimental import pallas as pl
from jax.experimental.pallas import tpu as pltpu


def _ffn_kernel_single(x_ref, w1_ref, b1_ref, w2_ref, b2_ref, o_ref):
    """Whole hidden dim in one step: out = relu(x @ W1 + b1) @ W2 + b2.

    x_ref : (bm, C)  x.dtype   w1_ref : (C, H)  bf16    b1_ref : (1, H) f32
    w2_ref: (H, C)   bf16      b2_ref : (1, C)  f32     o_ref  : (bm, C)
    """
    x = x_ref[...].astype(w1_ref.dtype)
    h = jnp.dot(x, w1_ref[...], preferred_element_type=jnp.float32)
    h = jnp.maximum(h + b1_ref[...], 0.0)
    out = jnp.dot(h.astype(w2_ref.dtype), w2_ref[...],
                  preferred_element_type=jnp.float32)
    o_ref[...] = (out + b2_ref[...]).astype(o_ref.dtype)


def _ffn_kernel_acc(x_ref, w1_ref, b1_ref, w2_ref, b2_ref, o_ref, acc_ref):
    """H-tiled step of out = relu(x @ W1 + b1) @ W2 + b2 with resident f32 accumulator.

    x_ref : (bm, C)  x.dtype   w1_ref : (C, bh)  bf16    b1_ref : (1, bh) f32
    w2_ref: (bh, C)  bf16      b2_ref : (1, C)   f32     o_ref  : (bm, C)
    acc_ref: (bm, C) f32, resident across the H grid axis.
    """
    h_idx = pl.program_id(1)

    @pl.when(h_idx == 0)
    def _():
        acc_ref[...] = jnp.zeros_like(acc_ref)

    x = x_ref[...].astype(w1_ref.dtype)
    # First linear (this H-chunk) + bias + ReLU, applied in f32.
    h = jnp.dot(x, w1_ref[...], preferred_element_type=jnp.float32)
    h = jnp.maximum(h + b1_ref[...], 0.0)
    # Second linear: this H-chunk's contribution, accumulated in f32.
    acc_ref[...] += jnp.dot(h.astype(w2_ref.dtype), w2_ref[...],
                            preferred_element_type=jnp.float32)

    @pl.when(h_idx == pl.num_programs(1) - 1)
    def _():
        o_ref[...] = (acc_ref[...] + b2_ref[...]).astype(o_ref.dtype)


def _round_up(x, m):
    return (x + m - 1) // m * m


def _pick_block_h(H, requested):
    """Largest multiple of 128 that divides H and is <= requested, else full H."""
    if H <= requested:
        return H
    cand = (min(requested, H) // 128) * 128
    while cand >= 128:
        if H % cand == 0:
            return cand
        cand -= 128
    return H


@functools.partial(jax.jit, static_argnames=("block_m", "block_h", "compute_dtype"))
def feed_forward(x, w1, b1, w2, b2, *, block_m=256, block_h=512,
                 compute_dtype=jnp.bfloat16):
    """x: (B, T, C) -> (B, T, C). Weights in (in_features, out_features) layout."""
    B, T, C = x.shape
    H = w1.shape[1]
    M = B * T

    # Clamp tiles to the problem size; keep sublane (8) / lane (128) legality.
    block_m = min(block_m, _round_up(M, 8))
    block_h = _pick_block_h(H, block_h)
    grid_h = H // block_h

    x2d = x.reshape(M, C)                       # cast to bf16 happens in-kernel
    w1c = w1.astype(compute_dtype)
    w2c = w2.astype(compute_dtype)
    b1f = b1.astype(jnp.float32)
    b2f = b2.astype(jnp.float32)

    grid = (pl.cdiv(M, block_m), grid_h)

    # VMEM budget: double-buffered input/output tiles + f32 accumulator + f32
    # intermediate activation, with ~50% headroom (clamped to 64 MiB for v7x).
    w_bpe = jnp.dtype(compute_dtype).itemsize
    x_bpe = x.dtype.itemsize
    out_bpe = x.dtype.itemsize
    vmem_bytes = 2 * (block_m * C * x_bpe       # x tile
                      + C * block_h * w_bpe     # W1 tile
                      + block_h * 4             # b1 tile
                      + block_h * C * w_bpe     # W2 tile
                      + C * 4                   # b2 tile
                      + block_m * C * out_bpe)  # out tile
    vmem_bytes += block_m * C * 4               # f32 accumulator scratch
    vmem_bytes += block_m * block_h * 4         # f32 intermediate activation
    vmem_bytes = int(vmem_bytes * 1.5)
    vmem_bytes = max(32 << 20, min(vmem_bytes, 64 << 20))

    cost = pl.CostEstimate(
        flops=4 * M * C * H,                    # two matmuls, 2*M*H*C each
        transcendentals=0,
        bytes_accessed=(M * C * x_bpe + C * H * w_bpe + H * C * w_bpe
                        + H * 4 + C * 4 + M * C * out_bpe),
    )

    in_specs = [
        pl.BlockSpec((block_m, C), lambda i, h: (i, 0)),    # x rows tile
        pl.BlockSpec((C, block_h), lambda i, h: (0, h)),    # W1 H-chunk
        pl.BlockSpec((1, block_h), lambda i, h: (0, h)),    # b1 H-chunk
        pl.BlockSpec((block_h, C), lambda i, h: (h, 0)),    # W2 H-chunk
        pl.BlockSpec((1, C), lambda i, h: (0, 0)),          # b2
    ]
    out_spec = pl.BlockSpec((block_m, C), lambda i, h: (i, 0))

    if grid_h == 1:
        kernel = _ffn_kernel_single
        scratch_shapes = []
    else:
        kernel = _ffn_kernel_acc
        scratch_shapes = [pltpu.VMEM((block_m, C), jnp.float32)]

    out2d = pl.pallas_call(
        kernel,
        out_shape=jax.ShapeDtypeStruct((M, C), x.dtype),
        grid_spec=pltpu.PrefetchScalarGridSpec(
            num_scalar_prefetch=0,
            grid=grid,
            in_specs=in_specs,
            out_specs=out_spec,
            scratch_shapes=scratch_shapes,
        ),
        compiler_params=pltpu.CompilerParams(
            dimension_semantics=("parallel", "arbitrary"),
            vmem_limit_bytes=vmem_bytes,
        ),
        cost_estimate=cost,
    )(x2d, w1c, b1f, w2c, b2f)

    return out2d.reshape(B, T, C)


def init_params(key, n_embd):
    """Deterministic init mirroring nn.Linear: U(-1/sqrt(fan_in), 1/sqrt(fan_in))."""
    h = 4 * n_embd
    k1, k2, k3, k4 = jax.random.split(key, 4)
    lim1 = 1.0 / jnp.sqrt(n_embd)
    lim2 = 1.0 / jnp.sqrt(h)
    w1 = jax.random.uniform(k1, (n_embd, h), jnp.float32, -lim1, lim1)
    b1 = jax.random.uniform(k2, (1, h), jnp.float32, -lim1, lim1)
    w2 = jax.random.uniform(k3, (h, n_embd), jnp.float32, -lim2, lim2)
    b2 = jax.random.uniform(k4, (1, n_embd), jnp.float32, -lim2, lim2)
    return w1, b1, w2, b2


if __name__ == "__main__":
    B, T, n_embd = 2, 8, 32          # hidden dim = 4 * 32 = 128
    key = jax.random.PRNGKey(0)
    kx, kp = jax.random.split(key)

    x = jax.random.normal(kx, (B, T, n_embd), dtype=jnp.float32)
    w1, b1, w2, b2 = init_params(kp, n_embd)

    out = feed_forward(x, w1, b1, w2, b2)
    out = jax.block_until_ready(out)

    # Pure-JAX reference using the same bf16-rounded operands the kernel consumes
    # (f32 accumulation), so the comparison isolates kernel correctness.
    xb = x.reshape(-1, n_embd).astype(jnp.bfloat16).astype(jnp.float32)
    w1b = w1.astype(jnp.bfloat16).astype(jnp.float32)
    w2b = w2.astype(jnp.bfloat16).astype(jnp.float32)
    ref_h = jnp.maximum(xb @ w1b + b1, 0.0)
    ref_h = ref_h.astype(jnp.bfloat16).astype(jnp.float32)
    ref = (ref_h @ w2b + b2).reshape(B, T, n_embd)

    assert out.shape == (B, T, n_embd)
    assert jnp.allclose(out, ref, atol=3e-2, rtol=3e-2), (
        float(jnp.max(jnp.abs(out - ref))))

    print("KERNEL_OK")
</pallas_src>

<mosaic_0001>
module attributes {stable_mosaic.version = 11 : i64} {
  func.func @_ffn_kernel_single(%arg0: i32, %arg1: i32, %arg2: memref<16x32xf32, #tpu.memory_space<vmem>>, %arg3: memref<32x128xbf16, #tpu.memory_space<vmem>>, %arg4: memref<1x128xf32, #tpu.memory_space<vmem>>, %arg5: memref<128x32xbf16, #tpu.memory_space<vmem>>, %arg6: memref<1x32xf32, #tpu.memory_space<vmem>>, %arg7: memref<16x32xf32, #tpu.memory_space<vmem>>) attributes {dimension_semantics = [#tpu.dimension_semantics<parallel>, #tpu.dimension_semantics<arbitrary>], iteration_bounds = array<i64: 1, 1>, scalar_prefetch = 0 : i64, scratch_operands = 0 : i64, tpu.core_type = #tpu.core_type<tc>, window_params = [{transform_indices = @transform_0, window_bounds = array<i64: 16, 32>}, {transform_indices = @transform_1, window_bounds = array<i64: 32, 128>}, {transform_indices = @transform_2, window_bounds = array<i64: 1, 128>}, {transform_indices = @transform_3, window_bounds = array<i64: 128, 32>}, {pipeline_mode = #tpu.pipeline_mode<synchronous>, transform_indices = @transform_4, window_bounds = array<i64: 1, 32>}, {transform_indices = @transform_5, window_bounds = array<i64: 16, 32>}]} {
    %c0 = arith.constant 0 : index
    %c0_0 = arith.constant 0 : index
    %0 = vector.load %arg2[%c0, %c0_0] : memref<16x32xf32, #tpu.memory_space<vmem>>, vector<16x32xf32>
    %1 = arith.truncf %0 : vector<16x32xf32> to vector<16x32xbf16>
    %c0_1 = arith.constant 0 : index
    %c0_2 = arith.constant 0 : index
    %2 = vector.load %arg3[%c0_1, %c0_2] : memref<32x128xbf16, #tpu.memory_space<vmem>>, vector<32x128xbf16>
    %cst = arith.constant dense<0.000000e+00> : vector<16x128xf32>
    %3 = tpu.matmul %1, %2, %cst {dimension_numbers = #tpu.dot_dimension_numbers<[1], [0], [0], [1], [0, 0, 1, 1], [], []>} : vector<16x32xbf16>, vector<32x128xbf16>, vector<16x128xf32> -> vector<16x128xf32>
    %c0_3 = arith.constant 0 : index
    %c0_4 = arith.constant 0 : index
    %4 = vector.load %arg4[%c0_3, %c0_4] : memref<1x128xf32, #tpu.memory_space<vmem>>, vector<1x128xf32>
    %5 = vector.broadcast %4 : vector<1x128xf32> to vector<16x128xf32>
    %6 = arith.addf %3, %5 : vector<16x128xf32>
    %cst_5 = arith.constant 0.000000e+00 : f32
    %7 = vector.broadcast %cst_5 : f32 to vector<16x128xf32>
    %8 = arith.maximumf %6, %7 : vector<16x128xf32>
    %9 = arith.truncf %8 : vector<16x128xf32> to vector<16x128xbf16>
    %c0_6 = arith.constant 0 : index
    %c0_7 = arith.constant 0 : index
    %10 = vector.load %arg5[%c0_6, %c0_7] : memref<128x32xbf16, #tpu.memory_space<vmem>>, vector<128x32xbf16>
    %cst_8 = arith.constant dense<0.000000e+00> : vector<16x32xf32>
    %11 = tpu.matmul %9, %10, %cst_8 {dimension_numbers = #tpu.dot_dimension_numbers<[1], [0], [0], [1], [0, 0, 1, 1], [], []>} : vector<16x128xbf16>, vector<128x32xbf16>, vector<16x32xf32> -> vector<16x32xf32>
    %c0_9 = arith.constant 0 : index
    %c0_10 = arith.constant 0 : index
    %12 = vector.load %arg6[%c0_9, %c0_10] : memref<1x32xf32, #tpu.memory_space<vmem>>, vector<1x32xf32>
    %13 = vector.broadcast %12 : vector<1x32xf32> to vector<16x32xf32>
    %14 = arith.addf %11, %13 : vector<16x32xf32>
    %c0_11 = arith.constant 0 : index
    %c0_12 = arith.constant 0 : index
    %15 = vector.load %arg7[%c0_11, %c0_12] : memref<16x32xf32, #tpu.memory_space<vmem>>, vector<16x32xf32>
    tpu.vector_store %arg7[%c0_11, %c0_12], %14 {strides = array<i32>} : memref<16x32xf32, #tpu.memory_space<vmem>>, vector<16x32xf32>,
    return
  }
  func.func @transform_0(%arg0: i32, %arg1: i32) -> (i32, i32) {
    %c0_i32 = arith.constant 0 : i32
    %c0_i32_0 = arith.constant 0 : i32
    return %arg0, %c0_i32 : i32, i32
  }
  func.func @transform_1(%arg0: i32, %arg1: i32) -> (i32, i32) {
    %c0_i32 = arith.constant 0 : i32
    %c0_i32_0 = arith.constant 0 : i32
    return %c0_i32, %arg1 : i32, i32
  }
  func.func @transform_2(%arg0: i32, %arg1: i32) -> (i32, i32) {
    %c0_i32 = arith.constant 0 : i32
    %c0_i32_0 = arith.constant 0 : i32
    return %c0_i32, %arg1 : i32, i32
  }
  func.func @transform_3(%arg0: i32, %arg1: i32) -> (i32, i32) {
    %c0_i32 = arith.constant 0 : i32
    %c0_i32_0 = arith.constant 0 : i32
    return %arg1, %c0_i32 : i32, i32
  }
  func.func @transform_4(%arg0: i32, %arg1: i32) -> (i32, i32) {
    %c0_i32 = arith.constant 0 : i32
    %c0_i32_0 = arith.constant 0 : i32
    %c0_i32_1 = arith.constant 0 : i32
    return %c0_i32, %c0_i32_0 : i32, i32
  }
  func.func @transform_5(%arg0: i32, %arg1: i32) -> (i32, i32) {
    %c0_i32 = arith.constant 0 : i32
    %c0_i32_0 = arith.constant 0 : i32
    return %arg0, %c0_i32 : i32, i32
  }
}

</mosaic_0001>

<bundles_post_ra>
// kernel: feed_forward.1
= control target key start
LH: loop header
LB: loop body
LE: loop exit
PB: predicated region body
PF: predicated region fallthrough
CT: control target
= control target key end

     0   :  { %v318_v1 = vmov 0.0   ;;  %vm319_vm0 = vmmov 0   ;;  %vm48_vm1 = vcmask 261120   ;;  %s410_s0 = inlined_call_operand.vmem [shape: f32[16,32], index: 0, kind: input, shape index: {}]   ;;  %s411_s1 = inlined_call_operand.vmem [shape: bf16[32,128], index: 1, kind: input, shape index: {}]   ;;  %s412_s2 = inlined_call_operand.vmem [shape: f32[1,128], index: 2, kind: input, shape index: {}]   ;;  %s413_s3 = inlined_call_operand.vmem [shape: bf16[128,32], index: 3, kind: input, shape index: {}]   ;;  %s414_s4 = inlined_call_operand.vmem [shape: f32[1,32], index: 4, kind: input, shape index: {}]   ;;  %s415_s5 = inlined_call_operand.hbm [shape: f32[16,32], index: 5, kind: output, shape index: {}]  }
   0x1   :  { %v284_v0 = vld [vmem:[%s411_s1] sm:$0xff]   ;;  %251 = vmatprep.subr.bf16.mxu0 %v318_v1  ;;  %v285_v2 = vld [vmem:[%s411_s1 + $0x8] sm:$0xff]   ;;  %259 = vmatprep.subr.bf16.mxu1 %v318_v1  ;;  %v288_v8 = vld [vmem:[%s413_s3 + $0x10] sm:$0xff]  }
   0x2   :  { %252 = vmatpush3.bf16.msra.mxu0 %v284_v0  ;;  %255 = vmatprep.mubr.msk.bf16.mxu0 %vm319_vm0, %v318_v1  ;;  %v22_v3 = vld [vmem:[%s410_s0] sm:$0xff]  ;;  %v23_v4 = vld [vmem:[%s410_s0 + $0x8] sm:$0xff] }
   0x3   :  { %253 = vmatprep.subr.bf16.mxu0 %v318_v1  ;;  %v286_v5 = vld [vmem:[%s413_s3] sm:$0xff]   ;;  %275 = vmatprep.mubr.msk.bf16.mxu1 %vm319_vm0, %v318_v1  ;;  %v24_v6 = vpack.c.bf16 %v23_v4, %v22_v3  ;;  %v287_v7 = vld [vmem:[%s413_s3 + $0x8] sm:$0xff]  }
   0x4   :  { %260 = vmatpush3.bf16.msra.mxu1 %v286_v5 }
   0x5   :  { %261 = vmatprep.subr.bf16.mxu1 %v318_v1 }
   0x6   :  { %254 = vmatpush3.bf16.msra.mxu0 %v285_v2 }
   0x8   :  { %262 = vmatpush3.bf16.msra.mxu1 %v287_v7 }
   0x9   :  { %256 = vmatmul.mubr.msk.bf16.vlgmr.msra.gmra.mrb[0].mxu0 %vm48_vm1, %v24_v6  ;;  %263 = vmatprep.subr.bf16.mxu1 %v318_v1 }
   0xa   :  { %10 = vsyncpa [#allocation3], 0  ;;  %v289_v9 = vld [vmem:[%s413_s3 + $0x18] sm:$0xff]   ;;  %v290_v10 = vld [vmem:[%s413_s3 + $0x20] sm:$0xff]  }
   0xb   :  { %v291_v11 = vld [vmem:[%s413_s3 + $0x28] sm:$0xff]   ;;  %v292_v12 = vld [vmem:[%s413_s3 + $0x30] sm:$0xff]   ;;  %v293_v13 = vld [vmem:[%s413_s3 + $0x38] sm:$0xff]   ;;  %s320_s3 = smov [#allocation2]  }
   0xc   :  { %264 = vmatpush3.bf16.msra.mxu1 %v288_v8  ;;  %v226_v14 = vld [vmem:[%s412_s2] ss:$0 sm:$0xff]  ;;  %s215_s19 = sshll.u32 %s320_s3, 4  ;;  %s216_s19 = int_to_ptr.vmem [resolvable:$true] %s215_s19 }
   0xd   :  { %265 = vmatprep.subr.bf16.mxu1 %v318_v1  ;;  %v230_v24 = vld [vmem:[%s414_s4] ss:$0 sm:$0xff]  ;;  %s294_s2 = scalar_lea.vmem %s216_s19, 256  ;;  %p299_p1 = scmp.lt.s32.totalorder %s216_s19, %s216_s19 }
   0xe   :  { %p295_p0 = scmp.ne.s32.totalorder %s216_s19, %s294_s2  ;;  %p300_p2 = scmp.lt.s32.totalorder %s294_s2, %s294_s2 }
  0x10   :  { %266 = vmatpush3.bf16.msra.mxu1 %v289_v9  ;;  %p301_p3 = por %p300_p2, %p299_p1 }
  0x11   :  { %267 = vmatprep.subr.bf16.mxu1 %v318_v1 }
  0x12   :  { %p302_p4 = pnand %p301_p3, %p295_p0 }
  0x14   :  { %268 = vmatpush3.bf16.msra.mxu1 %v290_v10 }
  0x15   :  { %269 = vmatprep.subr.bf16.mxu1 %v318_v1 }
  0x18   :  { %270 = vmatpush3.bf16.msra.mxu1 %v291_v11 }
  0x19   :  { %271 = vmatprep.subr.bf16.mxu1 %v318_v1 }
  0x1c   :  { %272 = vmatpush3.bf16.msra.mxu1 %v292_v12 }
  0x1d   :  { %273 = vmatprep.subr.bf16.mxu1 %v318_v1 }
  0x20   :  { %274 = vmatpush3.bf16.msra.mxu1 %v293_v13 }
  0xdc   :  { %v86_v15 = vpop.f32.mrb[0].mxu0 }
  0xdd   :  { %v87_v16 = vadd.f32 %v226_v14, %v86_v15  ;;  %v257_v17 = vpop.f32.mrb[1].mxu0 }
  0xde   :  { %v89_v18 = vpop.f32.mrb[2].mxu0 }
  0xdf   :  { %v90_v19 = vadd.f32 %v226_v14, %v89_v18  ;;  %v258_v20 = vpop.f32.mrb[3].mxu0  ;;  %v93_v21 = vmax.f32 %v87_v16, 0.0 }
  0xe1   :  { %v94_v22 = vmax.f32 %v90_v19, 0.0 }
  0xe3   :  { %v95_v23 = vpack.c.bf16 %v94_v22, %v93_v21 }
  0xe5   :  { %276 = vmatmul.mubr.bf16.vlgmr.msra.gmra.mrb[0].mxu1 %v95_v23 }
 0x1b8   :  { %v201_v25 = vpop.f32.mrb[0].mxu1 }
 0x1b9   :  { %v202_v26 = vadd.f32 %v230_v24, %v201_v25  ;;  %v277_v27 = vpop.f32.mrb[1].mxu1 }
 0x1ba   :  { %v204_v28 = vpop.f32.mrb[2].mxu1 }
 0x1bb   :  { %208 = vst.msk [vmem:[#allocation2] sm:$0xff] %vm48_vm1, %v202_v26  ;;  %v205_v29 = vadd.f32 %v230_v24, %v204_v28  ;;  %v278_v30 = vpop.f32.mrb[3].mxu1 }
 0x1bd   :  { %209 = vst.msk [vmem:[#allocation2 + $0x8] sm:$0xff] %vm48_vm1, %v205_v29 }
 0x1be   :  { %305 = shalt.err (!%p302_p4)
}
 0x1bf   :  { %s306_s21 = scalar_lea.hbm %s415_s5, 256 }
 0x1c0   :  { %p307_p5 = scmp.ne.s32.totalorder %s415_s5, %s306_s21  ;;  %p310_p6 = scmp.lt.u32.totalorder %s306_s21, %s415_s5 }
 0x1c2   :  { %p312_p7 = pnand %p310_p6, %p307_p5 }
 0x1c4   :  { %315 = shalt.err (!%p312_p7)
}
 0x1c5   :  { %s321_s26 = smov 128   ;;  %s322_s27 = smov 8  }
 0x1c6   :  { %221 = dma.vmem_to_hbm [thread:$0]  %s216_s19, 256, %s415_s5, [#allocation3], %s321_s26, %s321_s26, %s322_s27  }
 0x1c7   :  { %316 = dma.done.wait [#allocation3], 256  }
 0x1c8   :  { %317 = vsyncadd [#allocation3], 4294967040 }
 0x1c9   :  { %225 = vsyncpa [#allocation3], 1 }

</bundles_post_ra>
